<compile_context>
chip_gen: v7x
topology: tpu7x:2x2x1
jax: 0.10.0
libtpu: 0.0.40
codegen_flags: <defaults>
</compile_context>

<pallas_src>
import jax
import jax.numpy as jnp
from jax import lax
from jax.experimental import pallas as pl
from jax.experimental.pallas import tpu as pltpu

_LANE = 128   # lane width: last dims padded to multiples of this (lane-dense stores)
_TB = 128     # batch-tile rows per grid step (128-aligned for v5e MXU as well)


def _round_up(n, m):
    return ((n + m - 1) // m) * m


def _pad_axis(a, axis, target):
    pad = target - a.shape[axis]
    if pad == 0:
        return a
    widths = [(0, 0)] * a.ndim
    widths[axis] = (0, pad)
    return jnp.pad(a, widths)


# ------- pass 1: FC_Net features + forward_ML mean + left gram factor --------
def _feat_mean_diag_kernel(x_ref, w1_ref, b1_ref, w2_ref, b2_ref, mu_ref, cov_ref,
                           feats_ref, fcov_ref, mean_ref):
    h = jnp.dot(x_ref[...], w1_ref[...], preferred_element_type=jnp.float32)
    h = jnp.maximum(h + b1_ref[...], 0.0)
    feats = jnp.dot(h, w2_ref[...], preferred_element_type=jnp.float32) + b2_ref[...]
    feats_ref[...] = feats
    # forward_ML: features @ mu
    mean_ref[...] = jnp.dot(feats, mu_ref[...], preferred_element_type=jnp.float32)
    # diagonal covariance: column scale on the VPU, no [feat, feat] MXU matmul
    fcov_ref[...] = feats * cov_ref[...]


def _feat_mean_dense_kernel(x_ref, w1_ref, b1_ref, w2_ref, b2_ref, mu_ref, cov_ref,
                            feats_ref, fcov_ref, mean_ref):
    h = jnp.dot(x_ref[...], w1_ref[...], preferred_element_type=jnp.float32)
    h = jnp.maximum(h + b1_ref[...], 0.0)
    feats = jnp.dot(h, w2_ref[...], preferred_element_type=jnp.float32) + b2_ref[...]
    feats_ref[...] = feats
    mean_ref[...] = jnp.dot(feats, mu_ref[...], preferred_element_type=jnp.float32)
    # dense covariance: feats @ cov hoisted here (depends only on the row tile)
    fcov_ref[...] = jnp.dot(feats, cov_ref[...], preferred_element_type=jnp.float32)


# ------- pass 2: pred_cov[i, j] = fcov_i @ feats_j.T (tiled gram) -------------
def _gram_kernel(fcov_ref, fj_ref, out_ref):
    # contraction over the feature axis with transposed RHS expressed directly
    # (no XLU transpose / .T materialization)
    out_ref[...] = lax.dot_general(
        fcov_ref[...], fj_ref[...],
        dimension_numbers=(((1,), (1,)), ((), ())),
        preferred_element_type=jnp.float32)


def llvi_forward(x, w1, b1, w2, b2, ll_mu, ll_cov, *, cov_is_diag=True):
    """forward_single semantics: returns (pred_mean [B, out_dim], pred_cov [B, B]).

    pred_mean is identical to forward_ML(x).
    If cov_is_diag (module default: diag(exp(log_var))), ll_cov is the [feat]
    diagonal; otherwise a full [feat, feat] covariance matrix."""
    f32 = jnp.float32
    B, in_dim = x.shape
    hidden = w1.shape[1]
    feat = w2.shape[1]
    out_dim = ll_mu.shape[1]

    B_pad = _round_up(B, _TB)
    hidP = _round_up(hidden, _LANE)
    featP = _round_up(feat, _LANE)
    outP = _round_up(out_dim, _LANE)
    nb = B_pad // _TB

    # Wrapper-side layout plumbing: zero-pad to lane-dense shapes (exact zeros
    # contribute nothing to any of the contractions).
    xp = _pad_axis(x.astype(f32), 0, B_pad)
    w1p = _pad_axis(w1.astype(f32), 1, hidP)
    b1p = _pad_axis(b1.reshape(1, -1).astype(f32), 1, hidP)
    w2p = _pad_axis(_pad_axis(w2.astype(f32), 0, hidP), 1, featP)
    b2p = _pad_axis(b2.reshape(1, -1).astype(f32), 1, featP)
    mup = _pad_axis(_pad_axis(ll_mu.astype(f32), 0, featP), 1, outP)

    if cov_is_diag:
        covp = _pad_axis(ll_cov.reshape(1, -1).astype(f32), 1, featP)
        feat_kernel = _feat_mean_diag_kernel
        cov_spec = pl.BlockSpec((1, featP), lambda i: (0, 0))
    else:
        covp = _pad_axis(_pad_axis(ll_cov.astype(f32), 0, featP), 1, featP)
        feat_kernel = _feat_mean_dense_kernel
        cov_spec = pl.BlockSpec((featP, featP), lambda i: (0, 0))

    def const1(*shape):  # resident parameter: block index never changes
        return pl.BlockSpec(shape, lambda i: (0,) * len(shape))

    feats, fcov, mean = pl.pallas_call(
        feat_kernel,
        out_shape=(jax.ShapeDtypeStruct((B_pad, featP), f32),
                   jax.ShapeDtypeStruct((B_pad, featP), f32),
                   jax.ShapeDtypeStruct((B_pad, outP), f32)),
        grid=(nb,),
        in_specs=[pl.BlockSpec((_TB, in_dim), lambda i: (i, 0)),
                  const1(in_dim, hidP),
                  const1(1, hidP),
                  const1(hidP, featP),
                  const1(1, featP),
                  const1(featP, outP),
                  cov_spec],
        out_specs=(pl.BlockSpec((_TB, featP), lambda i: (i, 0)),
                   pl.BlockSpec((_TB, featP), lambda i: (i, 0)),
                   pl.BlockSpec((_TB, outP), lambda i: (i, 0))),
        compiler_params=pltpu.CompilerParams(
            dimension_semantics=("parallel",)),
    )(xp, w1p, b1p, w2p, b2p, mup, covp)

    pred_cov = pl.pallas_call(
        _gram_kernel,
        out_shape=jax.ShapeDtypeStruct((B_pad, B_pad), f32),
        grid=(nb, nb),
        in_specs=[pl.BlockSpec((_TB, featP), lambda i, j: (i, 0)),
                  pl.BlockSpec((_TB, featP), lambda i, j: (j, 0))],
        out_specs=pl.BlockSpec((_TB, _TB), lambda i, j: (i, j)),
        compiler_params=pltpu.CompilerParams(
            dimension_semantics=("parallel", "parallel")),
    )(fcov, feats)

    return mean[:B, :out_dim], pred_cov[:B, :B]


if __name__ == "__main__":
    # Small shapes consistent with the module:
    #   FC_Net input dim = 16, hidden = 32, feature_dim = 32, out_dim = 8, batch = 8
    B, in_dim, hidden, feature_dim, out_dim = 8, 16, 32, 32, 8

    key = jax.random.PRNGKey(0)
    kx, k1, k2, k3, k4 = jax.random.split(key, 5)

    x = jax.random.normal(kx, (B, in_dim), dtype=jnp.float32)

    # FC_Net feature extractor parameters.
    w1 = 0.1 * jax.random.normal(k1, (in_dim, hidden), dtype=jnp.float32)
    b1 = jnp.zeros((1, hidden), dtype=jnp.float32)
    w2 = 0.1 * jax.random.normal(k2, (hidden, feature_dim), dtype=jnp.float32)
    b2 = jnp.zeros((1, feature_dim), dtype=jnp.float32)

    # WeightDistribution: Gaussian last layer, mean mu, diagonal covariance
    # (prior_mu = 0, prior_log_var = 0 -> cov = I, the module defaults).
    ll_mu = 0.1 * jax.random.normal(k3, (feature_dim, out_dim), dtype=jnp.float32)
    ll_log_var = jnp.zeros((feature_dim,), dtype=jnp.float32)
    ll_cov_diag = jnp.exp(ll_log_var)

    # Pure-JAX reference.
    feats_ref = jnp.maximum(x @ w1 + b1, 0.0) @ w2 + b2
    mean_ref = feats_ref @ ll_mu

    # --- diagonal-covariance path (module default) ---
    pred_mean, pred_cov = llvi_forward(x, w1, b1, w2, b2, ll_mu, ll_cov_diag,
                                       cov_is_diag=True)
    jax.block_until_ready((pred_mean, pred_cov))
    cov_ref = feats_ref @ jnp.diag(ll_cov_diag) @ feats_ref.T
    assert jnp.allclose(pred_mean, mean_ref, atol=1e-5, rtol=1e-5)
    assert jnp.allclose(pred_cov, cov_ref, atol=1e-5, rtol=1e-5)

    # --- dense-covariance path (genuinely full ll_cov) ---
    a_rnd = jax.random.normal(k4, (feature_dim, feature_dim), dtype=jnp.float32)
    ll_cov_full = (a_rnd @ a_rnd.T) / feature_dim
    pred_mean_d, pred_cov_d = llvi_forward(x, w1, b1, w2, b2, ll_mu, ll_cov_full,
                                           cov_is_diag=False)
    jax.block_until_ready((pred_mean_d, pred_cov_d))
    cov_ref_d = feats_ref @ ll_cov_full @ feats_ref.T
    assert jnp.allclose(pred_mean_d, mean_ref, atol=1e-5, rtol=1e-5)
    assert jnp.allclose(pred_cov_d, cov_ref_d, atol=1e-4, rtol=1e-4)

    print("KERNEL_OK")
</pallas_src>

<mosaic_0001>
module attributes {stable_mosaic.version = 11 : i64} {
  func.func @_feat_mean_diag_kernel(%arg0: i32, %arg1: memref<128x16xf32, #tpu.memory_space<vmem>>, %arg2: memref<16x128xf32, #tpu.memory_space<vmem>>, %arg3: memref<1x128xf32, #tpu.memory_space<vmem>>, %arg4: memref<128x128xf32, #tpu.memory_space<vmem>>, %arg5: memref<1x128xf32, #tpu.memory_space<vmem>>, %arg6: memref<128x128xf32, #tpu.memory_space<vmem>>, %arg7: memref<1x128xf32, #tpu.memory_space<vmem>>, %arg8: memref<128x128xf32, #tpu.memory_space<vmem>>, %arg9: memref<128x128xf32, #tpu.memory_space<vmem>>, %arg10: memref<128x128xf32, #tpu.memory_space<vmem>>) attributes {dimension_semantics = [#tpu.dimension_semantics<parallel>], iteration_bounds = array<i64: 1>, scalar_prefetch = 0 : i64, scratch_operands = 0 : i64, tpu.core_type = #tpu.core_type<tc>, window_params = [{transform_indices = @transform_0, window_bounds = array<i64: 128, 16>}, {pipeline_mode = #tpu.pipeline_mode<synchronous>, transform_indices = @transform_1, window_bounds = array<i64: 16, 128>}, {pipeline_mode = #tpu.pipeline_mode<synchronous>, transform_indices = @transform_2, window_bounds = array<i64: 1, 128>}, {pipeline_mode = #tpu.pipeline_mode<synchronous>, transform_indices = @transform_3, window_bounds = array<i64: 128, 128>}, {pipeline_mode = #tpu.pipeline_mode<synchronous>, transform_indices = @transform_4, window_bounds = array<i64: 1, 128>}, {pipeline_mode = #tpu.pipeline_mode<synchronous>, transform_indices = @transform_5, window_bounds = array<i64: 128, 128>}, {pipeline_mode = #tpu.pipeline_mode<synchronous>, transform_indices = @transform_6, window_bounds = array<i64: 1, 128>}, {transform_indices = @transform_7, window_bounds = array<i64: 128, 128>}, {transform_indices = @transform_8, window_bounds = array<i64: 128, 128>}, {transform_indices = @transform_9, window_bounds = array<i64: 128, 128>}]} {
    %c0 = arith.constant 0 : index
    %c0_0 = arith.constant 0 : index
    %0 = vector.load %arg1[%c0, %c0_0] : memref<128x16xf32, #tpu.memory_space<vmem>>, vector<128x16xf32>
    %c0_1 = arith.constant 0 : index
    %c0_2 = arith.constant 0 : index
    %1 = vector.load %arg2[%c0_1, %c0_2] : memref<16x128xf32, #tpu.memory_space<vmem>>, vector<16x128xf32>
    %cst = arith.constant dense<0.000000e+00> : vector<128x128xf32>
    %2 = tpu.matmul %0, %1, %cst {dimension_numbers = #tpu.dot_dimension_numbers<[1], [0], [0], [1], [0, 0, 1, 1], [], []>} : vector<128x16xf32>, vector<16x128xf32>, vector<128x128xf32> -> vector<128x128xf32>
    %c0_3 = arith.constant 0 : index
    %c0_4 = arith.constant 0 : index
    %3 = vector.load %arg3[%c0_3, %c0_4] : memref<1x128xf32, #tpu.memory_space<vmem>>, vector<1x128xf32>
    %4 = vector.broadcast %3 : vector<1x128xf32> to vector<128x128xf32>
    %5 = arith.addf %2, %4 : vector<128x128xf32>
    %cst_5 = arith.constant 0.000000e+00 : f32
    %6 = vector.broadcast %cst_5 : f32 to vector<128x128xf32>
    %7 = arith.maximumf %5, %6 : vector<128x128xf32>
    %c0_6 = arith.constant 0 : index
    %c0_7 = arith.constant 0 : index
    %8 = vector.load %arg4[%c0_6, %c0_7] : memref<128x128xf32, #tpu.memory_space<vmem>>, vector<128x128xf32>
    %cst_8 = arith.constant dense<0.000000e+00> : vector<128x128xf32>
    %9 = tpu.matmul %7, %8, %cst_8 {dimension_numbers = #tpu.dot_dimension_numbers<[1], [0], [0], [1], [0, 0, 1, 1], [], []>} : vector<128x128xf32>, vector<128x128xf32>, vector<128x128xf32> -> vector<128x128xf32>
    %c0_9 = arith.constant 0 : index
    %c0_10 = arith.constant 0 : index
    %10 = vector.load %arg5[%c0_9, %c0_10] : memref<1x128xf32, #tpu.memory_space<vmem>>, vector<1x128xf32>
    %11 = vector.broadcast %10 : vector<1x128xf32> to vector<128x128xf32>
    %12 = arith.addf %9, %11 : vector<128x128xf32>
    %c0_11 = arith.constant 0 : index
    %c0_12 = arith.constant 0 : index
    %13 = vector.load %arg8[%c0_11, %c0_12] : memref<128x128xf32, #tpu.memory_space<vmem>>, vector<128x128xf32>
    tpu.vector_store %arg8[%c0_11, %c0_12], %12 {strides = array<i32>} : memref<128x128xf32, #tpu.memory_space<vmem>>, vector<128x128xf32>,
    %c0_13 = arith.constant 0 : index
    %c0_14 = arith.constant 0 : index
    %14 = vector.load %arg6[%c0_13, %c0_14] : memref<128x128xf32, #tpu.memory_space<vmem>>, vector<128x128xf32>
    %cst_15 = arith.constant dense<0.000000e+00> : vector<128x128xf32>
    %15 = tpu.matmul %12, %14, %cst_15 {dimension_numbers = #tpu.dot_dimension_numbers<[1], [0], [0], [1], [0, 0, 1, 1], [], []>} : vector<128x128xf32>, vector<128x128xf32>, vector<128x128xf32> -> vector<128x128xf32>
    %c0_16 = arith.constant 0 : index
    %c0_17 = arith.constant 0 : index
    %16 = vector.load %arg10[%c0_16, %c0_17] : memref<128x128xf32, #tpu.memory_space<vmem>>, vector<128x128xf32>
    tpu.vector_store %arg10[%c0_16, %c0_17], %15 {strides = array<i32>} : memref<128x128xf32, #tpu.memory_space<vmem>>, vector<128x128xf32>,
    %c0_18 = arith.constant 0 : index
    %c0_19 = arith.constant 0 : index
    %17 = vector.load %arg7[%c0_18, %c0_19] : memref<1x128xf32, #tpu.memory_space<vmem>>, vector<1x128xf32>
    %18 = vector.broadcast %17 : vector<1x128xf32> to vector<128x128xf32>
    %19 = arith.mulf %12, %18 : vector<128x128xf32>
    %c0_20 = arith.constant 0 : index
    %c0_21 = arith.constant 0 : index
    %20 = vector.load %arg9[%c0_20, %c0_21] : memref<128x128xf32, #tpu.memory_space<vmem>>, vector<128x128xf32>
    tpu.vector_store %arg9[%c0_20, %c0_21], %19 {strides = array<i32>} : memref<128x128xf32, #tpu.memory_space<vmem>>, vector<128x128xf32>,
    return
  }
  func.func @transform_0(%arg0: i32) -> (i32, i32) {
    %c0_i32 = arith.constant 0 : i32
    %c0_i32_0 = arith.constant 0 : i32
    return %arg0, %c0_i32 : i32, i32
  }
  func.func @transform_1(%arg0: i32) -> (i32, i32) {
    %c0_i32 = arith.constant 0 : i32
    %c0_i32_0 = arith.constant 0 : i32
    %c0_i32_1 = arith.constant 0 : i32
    return %c0_i32, %c0_i32_0 : i32, i32
  }
  func.func @transform_2(%arg0: i32) -> (i32, i32) {
    %c0_i32 = arith.constant 0 : i32
    %c0_i32_0 = arith.constant 0 : i32
    %c0_i32_1 = arith.constant 0 : i32
    return %c0_i32, %c0_i32_0 : i32, i32
  }
  func.func @transform_3(%arg0: i32) -> (i32, i32) {
    %c0_i32 = arith.constant 0 : i32
    %c0_i32_0 = arith.constant 0 : i32
    %c0_i32_1 = arith.constant 0 : i32
    return %c0_i32, %c0_i32_0 : i32, i32
  }
  func.func @transform_4(%arg0: i32) -> (i32, i32) {
    %c0_i32 = arith.constant 0 : i32
    %c0_i32_0 = arith.constant 0 : i32
    %c0_i32_1 = arith.constant 0 : i32
    return %c0_i32, %c0_i32_0 : i32, i32
  }
  func.func @transform_5(%arg0: i32) -> (i32, i32) {
    %c0_i32 = arith.constant 0 : i32
    %c0_i32_0 = arith.constant 0 : i32
    %c0_i32_1 = arith.constant 0 : i32
    return %c0_i32, %c0_i32_0 : i32, i32
  }
  func.func @transform_6(%arg0: i32) -> (i32, i32) {
    %c0_i32 = arith.constant 0 : i32
    %c0_i32_0 = arith.constant 0 : i32
    %c0_i32_1 = arith.constant 0 : i32
    return %c0_i32, %c0_i32_0 : i32, i32
  }
  func.func @transform_7(%arg0: i32) -> (i32, i32) {
    %c0_i32 = arith.constant 0 : i32
    %c0_i32_0 = arith.constant 0 : i32
    return %arg0, %c0_i32 : i32, i32
  }
  func.func @transform_8(%arg0: i32) -> (i32, i32) {
    %c0_i32 = arith.constant 0 : i32
    %c0_i32_0 = arith.constant 0 : i32
    return %arg0, %c0_i32 : i32, i32
  }
  func.func @transform_9(%arg0: i32) -> (i32, i32) {
    %c0_i32 = arith.constant 0 : i32
    %c0_i32_0 = arith.constant 0 : i32
    return %arg0, %c0_i32 : i32, i32
  }
}

</mosaic_0001>

<bundles_post_ra>
// kernel: tpu_custom_call.1
= control target key start
LH: loop header
LB: loop body
LE: loop exit
PB: predicated region body
PF: predicated region fallthrough
CT: control target
= control target key end

     0   :  { %15 = vsyncpa [#allocation3], 0  ;;  %s1416_s0 = inlined_call_operand.vmem [shape: f32[128,16], index: 0, kind: input, shape index: {}]   ;;  %s1417_s1 = inlined_call_operand.vmem [shape: f32[16,128], index: 1, kind: input, shape index: {}]   ;;  %s1418_s2 = inlined_call_operand.vmem [shape: f32[1,128], index: 2, kind: input, shape index: {}]   ;;  %s1419_s3 = inlined_call_operand.vmem [shape: f32[128,128], index: 3, kind: input, shape index: {}]   ;;  %s1420_s4 = inlined_call_operand.vmem [shape: f32[1,128], index: 4, kind: input, shape index: {}]   ;;  %s1421_s5 = inlined_call_operand.hbm [shape: f32[128,128], index: 5, kind: input, shape index: {}]   ;;  %s1422_s6 = inlined_call_operand.vmem [shape: f32[1,128], index: 6, kind: input, shape index: {}]   ;;  %s1423_s7 = inlined_call_operand.hbm [shape: f32[128,128], index: 7, kind: output, shape index: {0}]   ;;  %s1424_s8 = inlined_call_operand.hbm [shape: f32[128,128], index: 8, kind: output, shape index: {1}]   ;;  %s1425_s9 = inlined_call_operand.hbm [shape: f32[128,128], index: 9, kind: output, shape index: {2}]  }
   0x1   :  { %16 = vsyncpa [#allocation4], 0 }
   0x2   :  { %17 = vsyncpa [#allocation7], 0  ;;  %s1137_s30 = smov [#allocation2]   ;;  %s1043_s13 = scalar_lea.hbm %s1421_s5, 2048 }
   0x3   :  { %s33_s10 = sshll.u32 %s1137_s30, 4  ;;  %p1044_p0 = scmp.ne.s32.totalorder %s1421_s5, %s1043_s13  ;;  %s34_s10 = int_to_ptr.vmem [resolvable:$true] %s33_s10 }
   0x4   :  { %p1047_p1 = scmp.lt.u32.totalorder %s1043_s13, %s1421_s5 }
   0x6   :  { %p1049_p2 = pnand %p1047_p1, %p1044_p0 }
   0x8   :  { %1052 = shalt.err (!%p1049_p2)
}
   0x9   :  { %s1053_s18 = scalar_lea.vmem %s34_s10, 2048  ;;  %p1058_p4 = scmp.lt.s32.totalorder %s34_s10, %s34_s10 }
   0xa   :  { %p1054_p3 = scmp.ne.s32.totalorder %s34_s10, %s1053_s18  ;;  %p1059_p5 = scmp.lt.s32.totalorder %s1053_s18, %s1053_s18 }
   0xc   :  { %p1060_p6 = por %p1059_p5, %p1058_p4 }
   0xe   :  { %p1061_p7 = pnand %p1060_p6, %p1054_p3 }
  0x10   :  { %1064 = shalt.err (!%p1061_p7)
}
  0x11   :  { %s1138_s19 = smov 128   ;;  %s1139_s20 = smov 8  }
  0x12   :  { %39 = dma.hbm_to_vmem [thread:$0]  %s1421_s5, 2048, %s34_s10, [#allocation3], %s1138_s19, %s1138_s19, %s1139_s20  }
  0x13   :  { %1131 = dma.done.wait [#allocation3], 2048  }
  0x14   :  { %1132 = vsyncadd [#allocation3], 4294965248  ;;  %vm70_vm0 = vcmask 130048   ;;  %v61_v0 = vld [vmem:[%s1417_s1] sm:$0xff]  ;;  %v62_v1 = vld [vmem:[%s1417_s1 + $0x8] sm:$0xff]  ;;  %s1141_s30 = smov [#allocation5]  }
  0x15   :  { %v45_v2 = vld [vmem:[%s1416_s0] sm:$0xff]  ;;  %v969_v3 = vpack.c.bf16 %v62_v1, %v61_v0  ;;  %v46_v4 = vld [vmem:[%s1416_s0 + $0x8] sm:$0xff]  ;;  %v47_v5 = vld [vmem:[%s1416_s0 + $0x10] sm:$0xff]  ;;  %s685_s10 = sshll.u32 %s1141_s30, 4  ;;  %s686_s10 = int_to_ptr.vmem [resolvable:$true] %s685_s10 }
  0x16   :  { %833 = vmatprep.mubr.msk.f32.mxu0 %vm70_vm0, %v45_v2  ;;  %v280_v6 = vld [vmem:[%s1419_s3] sm:$0xff]  ;;  %v281_v7 = vld [vmem:[%s1419_s3 + $0x8] sm:$0xff]  ;;  %v282_v8 = vld [vmem:[%s1419_s3 + $0x10] sm:$0xff] }
  0x17   :  { %970 = vmatprep.subr.bf16.mxu0 %v969_v3  ;;  %v973_v9 = vpack.c.bf16 %v281_v7, %v280_v6  ;;  %v283_v10 = vld [vmem:[%s1419_s3 + $0x18] sm:$0xff]  ;;  %v284_v13 = vld [vmem:[%s1419_s3 + $0x20] sm:$0xff]  ;;  %v285_v14 = vld [vmem:[%s1419_s3 + $0x28] sm:$0xff] }
  0x18   :  { %972 = vmatpush3.bf16.msra.mxu0 %v969_v3  ;;  %v48_v11 = vld [vmem:[%s1416_s0 + $0x18] sm:$0xff]  ;;  %v977_v12 = vpack.c.bf16 %v283_v10, %v282_v8  ;;  %v49_v15 = vld [vmem:[%s1416_s0 + $0x20] sm:$0xff]  ;;  %v981_v16 = vpack.c.bf16 %v285_v14, %v284_v13  ;;  %v50_v17 = vld [vmem:[%s1416_s0 + $0x28] sm:$0xff] }
  0x19   :  { %974 = vmatprep.subr.bf16.mxu1 %v973_v9  ;;  %v286_v18 = vld [vmem:[%s1419_s3 + $0x30] sm:$0xff]  ;;  %v287_v19 = vld [vmem:[%s1419_s3 + $0x38] sm:$0xff]  ;;  %v288_v23 = vld [vmem:[%s1419_s3 + $0x40] sm:$0xff] }
  0x1a   :  { %976 = vmatpush3.bf16.msra.mxu1 %v973_v9  ;;  %v51_v20 = vld [vmem:[%s1416_s0 + $0x30] sm:$0xff]  ;;  %v985_v21 = vpack.c.bf16 %v287_v19, %v286_v18  ;;  %v52_v22 = vld [vmem:[%s1416_s0 + $0x38] sm:$0xff]  ;;  %v289_v24 = vld [vmem:[%s1419_s3 + $0x48] sm:$0xff] }
  0x1b   :  { %834 = vmatmul.mubr.msk.f32.vlgmr.msra.gmra.mrb[0].mxu0 %vm70_vm0, %v46_v4  ;;  %978 = vmatprep.subr.bf16.mxu1 %v977_v12  ;;  %v53_v25 = vld [vmem:[%s1416_s0 + $0x40] sm:$0xff]  ;;  %v989_v26 = vpack.c.bf16 %v289_v24, %v288_v23  ;;  %v54_v27 = vld [vmem:[%s1416_s0 + $0x48] sm:$0xff]  ;;  %v290_v28 = vld [vmem:[%s1419_s3 + $0x50] sm:$0xff] }
  0x1c   :  { %836 = vmatprep.mubr.msk.f32.mxu0 %vm70_vm0, %v47_v5  ;;  %v291_v29 = vld [vmem:[%s1419_s3 + $0x58] sm:$0xff]  ;;  %v55_v30 = vld [vmem:[%s1416_s0 + $0x50] sm:$0xff]  ;;  %v292_v33 = vld [vmem:[%s1419_s3 + $0x60] sm:$0xff] }
  0x1d   :  { %v993_v31 = vpack.c.bf16 %v291_v29, %v290_v28  ;;  %v56_v32 = vld [vmem:[%s1416_s0 + $0x58] sm:$0xff]  ;;  %v293_v34 = vld [vmem:[%s1419_s3 + $0x68] sm:$0xff]  ;;  %v57_v35 = vld [vmem:[%s1416_s0 + $0x60] sm:$0xff] }
  0x1e   :  { %980 = vmatpush3.bf16.msra.mxu1 %v977_v12  ;;  %v997_v36 = vpack.c.bf16 %v293_v34, %v292_v33  ;;  %v58_v37 = vld [vmem:[%s1416_s0 + $0x68] sm:$0xff]  ;;  %v59_v38 = vld [vmem:[%s1416_s0 + $0x70] sm:$0xff]  ;;  %v60_v39 = vld [vmem:[%s1416_s0 + $0x78] sm:$0xff] }
  0x1f   :  { %837 = vmatmul.mubr.msk.f32.gmra.mrb[2].mxu0 %vm70_vm0, %v48_v11  ;;  %982 = vmatprep.subr.bf16.mxu1 %v981_v16  ;;  %v294_v40 = vld [vmem:[%s1419_s3 + $0x70] sm:$0xff]  ;;  %v295_v41 = vld [vmem:[%s1419_s3 + $0x78] sm:$0xff]  ;;  %v464_v43 = vld [vmem:[#allocation2] sm:$0xff] }
  0x20   :  { %839 = vmatprep.mubr.msk.f32.mxu0 %vm70_vm0, %v49_v15  ;;  %v1001_v42 = vpack.c.bf16 %v295_v41, %v294_v40  ;;  %v465_v44 = vld [vmem:[#allocation2 + $0x8] sm:$0xff]  ;;  %v466_v45 = vld [vmem:[#allocation2 + $0x10] sm:$0xff]  ;;  %v467_v47 = vld [vmem:[#allocation2 + $0x18] sm:$0xff] }
  0x21   :  { %v1005_v46 = vpack.c.bf16 %v465_v44, %v464_v43  ;;  %v1009_v48 = vpack.c.bf16 %v467_v47, %v466_v45  ;;  %v468_v49 = vld [vmem:[#allocation2 + $0x20] sm:$0xff]  ;;  %v469_v50 = vld [vmem:[#allocation2 + $0x28] sm:$0xff]  ;;  %v470_v52 = vld [vmem:[#allocation2 + $0x30] sm:$0xff] }
  0x22   :  { %984 = vmatpush3.bf16.msra.mxu1 %v981_v16  ;;  %v1013_v51 = vpack.c.bf16 %v469_v50, %v468_v49  ;;  %v471_v53 = vld [vmem:[#allocation2 + $0x38] sm:$0xff]  ;;  %v472_v55 = vld [vmem:[#allocation2 + $0x40] sm:$0xff]  ;;  %v473_v56 = vld [vmem:[#allocation2 + $0x48] sm:$0xff] }
  0x23   :  { %840 = vmatmul.mubr.msk.f32.gmra.mrb[4].mxu0 %vm70_vm0, %v50_v17  ;;  %986 = vmatprep.subr.bf16.mxu1 %v985_v21  ;;  %v1017_v54 = vpack.c.bf16 %v471_v53, %v470_v52  ;;  %v1021_v57 = vpack.c.bf16 %v473_v56, %v472_v55  ;;  %v474_v58 = vld [vmem:[#allocation2 + $0x50] sm:$0xff]  ;;  %v475_v59 = vld [vmem:[#allocation2 + $0x58] sm:$0xff]  ;;  %v476_v61 = vld [vmem:[#allocation2 + $0x60] sm:$0xff] }
  0x24   :  { %842 = vmatprep.mubr.msk.f32.mxu0 %vm70_vm0, %v51_v20  ;;  %1006 = vmatprep.subr.bf16.mxu0 %v1005_v46  ;;  %v1025_v60 = vpack.c.bf16 %v475_v59, %v474_v58  ;;  %v477_v62 = vld [vmem:[#allocation2 + $0x68] sm:$0xff]  ;;  %v728_v0 = vld [vmem:[%s1418_s2] ss:$0 sm:$0xff]  ;;  %v478_v49 = vld [vmem:[#allocation2 + $0x70] sm:$0xff] }
  0x25   :  { %1008 = vmatpush3.bf16.msra.mxu0 %v1005_v46  ;;  %v1029_v63 = vpack.c.bf16 %v477_v62, %v476_v61  ;;  %v479_v50 = vld [vmem:[#allocation2 + $0x78] sm:$0xff]  ;;  %v1332_v52 = vld [vmem:[%s1420_s4] ss:$0 sm:$0xff]  ;;  %s1140_s4 = smov [#allocation6]  }
  0x26   :  { %988 = vmatpush3.bf16.msra.mxu1 %v985_v21  ;;  %1010 = vmatprep.subr.bf16.mxu0 %v1009_v48 }
  0x27   :  { %843 = vmatmul.mubr.msk.f32.gmra.mrb[6].mxu0 %vm70_vm0, %v52_v22  ;;  %990 = vmatprep.subr.bf16.mxu1 %v989_v26 }
  0x28   :  { %845 = vmatprep.mubr.msk.f32.mxu0 %vm70_vm0, %v53_v25 }
  0x29   :  { %1012 = vmatpush3.bf16.msra.mxu0 %v1009_v48 }
  0x2a   :  { %992 = vmatpush3.bf16.msra.mxu1 %v989_v26  ;;  %1014 = vmatprep.subr.bf16.mxu0 %v1013_v51 }
  0x2b   :  { %846 = vmatmul.mubr.msk.f32.gmra.mrb[8].mxu0 %vm70_vm0, %v54_v27  ;;  %994 = vmatprep.subr.bf16.mxu1 %v993_v31 }
  0x2c   :  { %848 = vmatprep.mubr.msk.f32.mxu0 %vm70_vm0, %v55_v30 }
  0x2d   :  { %1016 = vmatpush3.bf16.msra.mxu0 %v1013_v51  ;;  %v1033_v51 = vpack.c.bf16 %v479_v50, %v478_v49 }
  0x2e   :  { %996 = vmatpush3.bf16.msra.mxu1 %v993_v31  ;;  %1018 = vmatprep.subr.bf16.mxu0 %v1017_v54 }
  0x2f   :  { %849 = vmatmul.mubr.msk.f32.gmra.mrb[10].mxu0 %vm70_vm0, %v56_v32  ;;  %998 = vmatprep.subr.bf16.mxu1 %v997_v36 }
  0x30   :  { %851 = vmatprep.mubr.msk.f32.mxu0 %vm70_vm0, %v57_v35 }
  0x31   :  { %1020 = vmatpush3.bf16.msra.mxu0 %v1017_v54  ;;  %v1337_v54 = vld [vmem:[%s1422_s6] ss:$0 sm:$0xff]  ;;  %s697_s6 = sshll.u32 %s1140_s4, 4  ;;  %s698_s6 = int_to_ptr.vmem [resolvable:$true] %s697_s6 }
  0x32   :  { %1000 = vmatpush3.bf16.msra.mxu1 %v997_v36  ;;  %1022 = vmatprep.subr.bf16.mxu0 %v1021_v57  ;;  %s1065_s11 = scalar_lea.vmem %s698_s6, 2048  ;;  %p1070_p9 = scmp.lt.s32.totalorder %s698_s6, %s698_s6 }
  0x33   :  { %852 = vmatmul.mubr.msk.f32.gmra.mrb[12].mxu0 %vm70_vm0, %v58_v37  ;;  %1002 = vmatprep.subr.bf16.mxu1 %v1001_v42  ;;  %p1066_p8 = scmp.ne.s32.totalorder %s698_s6, %s1065_s11  ;;  %p1071_p10 = scmp.lt.s32.totalorder %s1065_s11, %s1065_s11 }
  0x34   :  { %854 = vmatprep.mubr.msk.f32.mxu0 %vm70_vm0, %v59_v38 }
  0x35   :  { %1024 = vmatpush3.bf16.msra.mxu0 %v1021_v57  ;;  %p1072_p11 = por %p1071_p10, %p1070_p9 }
  0x36   :  { %1004 = vmatpush3.bf16.msra.mxu1 %v1001_v42  ;;  %1026 = vmatprep.subr.bf16.mxu0 %v1025_v60 }
  0x37   :  { %855 = vmatmul.mubr.msk.f32.gmra.mrb[14].mxu0 %vm70_vm0, %v60_v39  ;;  %p1073_p12 = pnand %p1072_p11, %p1066_p8 }
  0x39   :  { %1028 = vmatpush3.bf16.msra.mxu0 %v1025_v60 }
  0x3a   :  { %1030 = vmatprep.subr.bf16.mxu0 %v1029_v63 }
  0x3d   :  { %1032 = vmatpush3.bf16.msra.mxu0 %v1029_v63 }
  0x3e   :  { %1034 = vmatprep.subr.bf16.mxu0 %v1033_v51 }
  0x41   :  { %1036 = vmatpush3.bf16.msra.mxu0 %v1033_v51 }
  0xee   :  { %v835_v1 = vpop.f32.mrb[0].mxu0 }
  0xef   :  { %v191_v2 = vadd.f32 %v835_v1, %v728_v0  ;;  %v185_v3 = vpop.f32.mrb[1].mxu0 }
  0xf0   :  { %v186_v4 = vadd.f32 %v728_v0, %v185_v3 }
  0xf1   :  { %v265_v7 = vmax.f32 %v191_v2, 0.0 }
  0xf2   :  { %v838_v5 = vpop.f32.mrb[2].mxu0  ;;  %v264_v6 = vmax.f32 %v186_v4, 0.0 }
  0xf3   :  { %v201_v8 = vadd.f32 %v838_v5, %v728_v0  ;;  %v195_v9 = vpop.f32.mrb[3].mxu0 }
  0xf4   :  { %v196_v10 = vadd.f32 %v728_v0, %v195_v9  ;;  %889 = vmatprep.mubr.f32.mxu1 %v264_v6 }
  0xf5   :  { %890 = vmatmul.mubr.f32.vlgmr.msra.gmra.mrb[0].mxu1 %v265_v7  ;;  %v267_v13 = vmax.f32 %v201_v8, 0.0 }
  0xf6   :  { %v266_v11 = vmax.f32 %v196_v10, 0.0  ;;  %v841_v12 = vpop.f32.mrb[4].mxu0 }
  0xf7   :  { %v211_v14 = vadd.f32 %v841_v12, %v728_v0  ;;  %v205_v15 = vpop.f32.mrb[5].mxu0 }
  0xf8   :  { %v206_v16 = vadd.f32 %v728_v0, %v205_v15  ;;  %892 = vmatprep.mubr.f32.mxu1 %v266_v11 }
  0xf9   :  { %893 = vmatmul.mubr.f32.gmra.mrb[2].mxu1 %v267_v13  ;;  %v269_v19 = vmax.f32 %v211_v14, 0.0 }
  0xfa   :  { %v268_v17 = vmax.f32 %v206_v16, 0.0  ;;  %v844_v18 = vpop.f32.mrb[6].mxu0 }
  0xfb   :  { %v221_v20 = vadd.f32 %v844_v18, %v728_v0  ;;  %v215_v21 = vpop.f32.mrb[7].mxu0 }
  0xfc   :  { %v216_v22 = vadd.f32 %v728_v0, %v215_v21  ;;  %895 = vmatprep.mubr.f32.mxu1 %v268_v17 }
  0xfd   :  { %896 = vmatmul.mubr.f32.gmra.mrb[4].mxu1 %v269_v19  ;;  %v271_v25 = vmax.f32 %v221_v20, 0.0 }
  0xfe   :  { %v270_v23 = vmax.f32 %v216_v22, 0.0  ;;  %v847_v24 = vpop.f32.mrb[8].mxu0 }
  0xff   :  { %v231_v26 = vadd.f32 %v847_v24, %v728_v0  ;;  %v225_v27 = vpop.f32.mrb[9].mxu0 }
 0x100   :  { %v226_v28 = vadd.f32 %v728_v0, %v225_v27  ;;  %898 = vmatprep.mubr.f32.mxu1 %v270_v23 }
 0x101   :  { %899 = vmatmul.mubr.f32.gmra.mrb[6].mxu1 %v271_v25  ;;  %v273_v31 = vmax.f32 %v231_v26, 0.0 }
 0x102   :  { %v272_v29 = vmax.f32 %v226_v28, 0.0  ;;  %v850_v30 = vpop.f32.mrb[10].mxu0 }
 0x103   :  { %v241_v32 = vadd.f32 %v850_v30, %v728_v0  ;;  %v235_v33 = vpop.f32.mrb[11].mxu0 }
 0x104   :  { %v236_v34 = vadd.f32 %v728_v0, %v235_v33  ;;  %901 = vmatprep.mubr.f32.mxu1 %v272_v29 }
 0x105   :  { %902 = vmatmul.mubr.f32.gmra.mrb[8].mxu1 %v273_v31  ;;  %v275_v37 = vmax.f32 %v241_v32, 0.0 }
 0x106   :  { %v274_v35 = vmax.f32 %v236_v34, 0.0  ;;  %v853_v36 = vpop.f32.mrb[12].mxu0 }
 0x107   :  { %v251_v38 = vadd.f32 %v853_v36, %v728_v0  ;;  %v245_v39 = vpop.f32.mrb[13].mxu0 }
 0x108   :  { %v246_v40 = vadd.f32 %v728_v0, %v245_v39  ;;  %904 = vmatprep.mubr.f32.mxu1 %v274_v35 }
 0x109   :  { %905 = vmatmul.mubr.f32.gmra.mrb[10].mxu1 %v275_v37  ;;  %v277_v43 = vmax.f32 %v251_v38, 0.0 }
 0x10a   :  { %v276_v41 = vmax.f32 %v246_v40, 0.0  ;;  %v856_v42 = vpop.f32.mrb[14].mxu0 }
 0x10b   :  { %v261_v44 = vadd.f32 %v856_v42, %v728_v0  ;;  %v255_v45 = vpop.f32.mrb[15].mxu0 }
 0x10c   :  { %v256_v46 = vadd.f32 %v728_v0, %v255_v45  ;;  %907 = vmatprep.mubr.f32.mxu1 %v276_v41 }
 0x10d   :  { %908 = vmatmul.mubr.f32.gmra.mrb[12].mxu1 %v277_v43  ;;  %v279_v48 = vmax.f32 %v261_v44, 0.0 }
 0x10e   :  { %v278_v47 = vmax.f32 %v256_v46, 0.0 }
 0x110   :  { %910 = vmatprep.mubr.f32.mxu1 %v278_v47 }
 0x111   :  { %911 = vmatmul.mubr.f32.gmra.mrb[14].mxu1 %v279_v48 }
 0x1c8   :  { %v891_v53 = vpop.f32.mrb[0].mxu1 }
 0x1c9   :  { %v375_v55 = vadd.f32 %v891_v53, %v1332_v52  ;;  %v369_v56 = vpop.f32.mrb[1].mxu1 }
 0x1ca   :  { %v370_v57 = vadd.f32 %v1332_v52, %v369_v56 }
 0x1cb   :  { %449 = vst [vmem:[#allocation5 + $0x8] sm:$0xff] %v375_v55  ;;  %v649_v58 = vmul.f32 %v1337_v54, %v375_v55 }
 0x1cc   :  { %448 = vst [vmem:[#allocation5] sm:$0xff] %v370_v57  ;;  %v648_v59 = vmul.f32 %v1337_v54, %v370_v57  ;;  %v894_v60 = vpop.f32.mrb[2].mxu1  ;;  %945 = vmatprep.mubr.f32.mxu0 %v370_v57 }
 0x1cd   :  { %665 = vst [vmem:[#allocation6 + $0x8] sm:$0xff] %v649_v58  ;;  %v385_v61 = vadd.f32 %v894_v60, %v1332_v52  ;;  %v379_v62 = vpop.f32.mrb[3].mxu1  ;;  %946 = vmatmul.mubr.f32.vlgmr.msra.gmra.mrb[16].mxu0 %v375_v55 }
 0x1ce   :  { %664 = vst [vmem:[#allocation6] sm:$0xff] %v648_v59  ;;  %v380_v63 = vadd.f32 %v1332_v52, %v379_v62 }
 0x1cf   :  { %451 = vst [vmem:[#allocation5 + $0x18] sm:$0xff] %v385_v61  ;;  %v651_v0 = vmul.f32 %v1337_v54, %v385_v61 }
 0x1d0   :  { %450 = vst [vmem:[#allocation5 + $0x10] sm:$0xff] %v380_v63  ;;  %v650_v1 = vmul.f32 %v1337_v54, %v380_v63  ;;  %v897_v2 = vpop.f32.mrb[4].mxu1  ;;  %948 = vmatprep.mubr.f32.mxu0 %v380_v63 }
 0x1d1   :  { %667 = vst [vmem:[#allocation6 + $0x18] sm:$0xff] %v651_v0  ;;  %v395_v3 = vadd.f32 %v897_v2, %v1332_v52  ;;  %v389_v4 = vpop.f32.mrb[5].mxu1  ;;  %949 = vmatmul.mubr.f32.gmra.mrb[18].mxu0 %v385_v61 }
 0x1d2   :  { %666 = vst [vmem:[#allocation6 + $0x10] sm:$0xff] %v650_v1  ;;  %v390_v5 = vadd.f32 %v1332_v52, %v389_v4 }
 0x1d3   :  { %453 = vst [vmem:[#allocation5 + $0x28] sm:$0xff] %v395_v3  ;;  %v653_v6 = vmul.f32 %v1337_v54, %v395_v3 }
 0x1d4   :  { %452 = vst [vmem:[#allocation5 + $0x20] sm:$0xff] %v390_v5  ;;  %v652_v7 = vmul.f32 %v1337_v54, %v390_v5  ;;  %v900_v8 = vpop.f32.mrb[6].mxu1  ;;  %951 = vmatprep.mubr.f32.mxu0 %v390_v5 }
 0x1d5   :  { %669 = vst [vmem:[#allocation6 + $0x28] sm:$0xff] %v653_v6  ;;  %v405_v9 = vadd.f32 %v900_v8, %v1332_v52  ;;  %v399_v10 = vpop.f32.mrb[7].mxu1  ;;  %952 = vmatmul.mubr.f32.gmra.mrb[20].mxu0 %v395_v3 }
 0x1d6   :  { %668 = vst [vmem:[#allocation6 + $0x20] sm:$0xff] %v652_v7  ;;  %v400_v11 = vadd.f32 %v1332_v52, %v399_v10 }
 0x1d7   :  { %455 = vst [vmem:[#allocation5 + $0x38] sm:$0xff] %v405_v9  ;;  %v655_v12 = vmul.f32 %v1337_v54, %v405_v9 }
 0x1d8   :  { %454 = vst [vmem:[#allocation5 + $0x30] sm:$0xff] %v400_v11  ;;  %v654_v13 = vmul.f32 %v1337_v54, %v400_v11  ;;  %v903_v14 = vpop.f32.mrb[8].mxu1  ;;  %954 = vmatprep.mubr.f32.mxu0 %v400_v11 }
 0x1d9   :  { %671 = vst [vmem:[#allocation6 + $0x38] sm:$0xff] %v655_v12  ;;  %v415_v15 = vadd.f32 %v903_v14, %v1332_v52  ;;  %v409_v16 = vpop.f32.mrb[9].mxu1  ;;  %955 = vmatmul.mubr.f32.gmra.mrb[22].mxu0 %v405_v9 }
 0x1da   :  { %670 = vst [vmem:[#allocation6 + $0x30] sm:$0xff] %v654_v13  ;;  %v410_v17 = vadd.f32 %v1332_v52, %v409_v16 }
 0x1db   :  { %457 = vst [vmem:[#allocation5 + $0x48] sm:$0xff] %v415_v15  ;;  %v657_v18 = vmul.f32 %v1337_v54, %v415_v15 }
 0x1dc   :  { %456 = vst [vmem:[#allocation5 + $0x40] sm:$0xff] %v410_v17  ;;  %v656_v19 = vmul.f32 %v1337_v54, %v410_v17  ;;  %v906_v20 = vpop.f32.mrb[10].mxu1  ;;  %957 = vmatprep.mubr.f32.mxu0 %v410_v17 }
 0x1dd   :  { %673 = vst [vmem:[#allocation6 + $0x48] sm:$0xff] %v657_v18  ;;  %v425_v21 = vadd.f32 %v906_v20, %v1332_v52  ;;  %v419_v22 = vpop.f32.mrb[11].mxu1  ;;  %958 = vmatmul.mubr.f32.gmra.mrb[24].mxu0 %v415_v15 }
 0x1de   :  { %672 = vst [vmem:[#allocation6 + $0x40] sm:$0xff] %v656_v19  ;;  %v420_v23 = vadd.f32 %v1332_v52, %v419_v22 }
 0x1df   :  { %459 = vst [vmem:[#allocation5 + $0x58] sm:$0xff] %v425_v21  ;;  %v659_v24 = vmul.f32 %v1337_v54, %v425_v21 }
 0x1e0   :  { %458 = vst [vmem:[#allocation5 + $0x50] sm:$0xff] %v420_v23  ;;  %v658_v25 = vmul.f32 %v1337_v54, %v420_v23  ;;  %v909_v26 = vpop.f32.mrb[12].mxu1  ;;  %960 = vmatprep.mubr.f32.mxu0 %v420_v23 }
 0x1e1   :  { %675 = vst [vmem:[#allocation6 + $0x58] sm:$0xff] %v659_v24  ;;  %v435_v27 = vadd.f32 %v909_v26, %v1332_v52  ;;  %v429_v28 = vpop.f32.mrb[13].mxu1  ;;  %961 = vmatmul.mubr.f32.gmra.mrb[26].mxu0 %v425_v21 }
 0x1e2   :  { %674 = vst [vmem:[#allocation6 + $0x50] sm:$0xff] %v658_v25  ;;  %v430_v29 = vadd.f32 %v1332_v52, %v429_v28 }
 0x1e3   :  { %461 = vst [vmem:[#allocation5 + $0x68] sm:$0xff] %v435_v27  ;;  %v661_v30 = vmul.f32 %v1337_v54, %v435_v27 }
 0x1e4   :  { %460 = vst [vmem:[#allocation5 + $0x60] sm:$0xff] %v430_v29  ;;  %v660_v31 = vmul.f32 %v1337_v54, %v430_v29  ;;  %v912_v32 = vpop.f32.mrb[14].mxu1  ;;  %963 = vmatprep.mubr.f32.mxu0 %v430_v29 }
 0x1e5   :  { %677 = vst [vmem:[#allocation6 + $0x68] sm:$0xff] %v661_v30  ;;  %v445_v33 = vadd.f32 %v912_v32, %v1332_v52  ;;  %v439_v34 = vpop.f32.mrb[15].mxu1  ;;  %964 = vmatmul.mubr.f32.gmra.mrb[28].mxu0 %v435_v27 }
 0x1e6   :  { %676 = vst [vmem:[#allocation6 + $0x60] sm:$0xff] %v660_v31  ;;  %v440_v35 = vadd.f32 %v1332_v52, %v439_v34 }
 0x1e7   :  { %463 = vst [vmem:[#allocation5 + $0x78] sm:$0xff] %v445_v33  ;;  %v663_v36 = vmul.f32 %v1337_v54, %v445_v33 }
 0x1e8   :  { %462 = vst [vmem:[#allocation5 + $0x70] sm:$0xff] %v440_v35  ;;  %v662_v37 = vmul.f32 %v1337_v54, %v440_v35  ;;  %966 = vmatprep.mubr.f32.mxu0 %v440_v35 }
 0x1e9   :  { %679 = vst [vmem:[#allocation6 + $0x78] sm:$0xff] %v663_v36  ;;  %967 = vmatmul.mubr.f32.gmra.mrb[30].mxu0 %v445_v33 }
 0x1ea   :  { %678 = vst [vmem:[#allocation6 + $0x70] sm:$0xff] %v662_v37 }
 0x1eb   :  { %1076 = shalt.err (!%p1073_p12)
}
 0x1ec   :  { %s1077_s13 = scalar_lea.hbm %s1424_s8, 2048 }
 0x1ed   :  { %p1078_p13 = scmp.ne.s32.totalorder %s1424_s8, %s1077_s13  ;;  %p1081_p0 = scmp.lt.u32.totalorder %s1077_s13, %s1424_s8 }
 0x1ef   :  { %p1083_p1 = pnand %p1081_p0, %p1078_p13 }
 0x1f1   :  { %1086 = shalt.err (!%p1083_p1)
}
 0x1f2   :  { %703 = dma.vmem_to_hbm [thread:$0]  %s698_s6, 2048, %s1424_s8, [#allocation7], %s1138_s19, %s1138_s19, %s1139_s20  }
 0x1f3   :  { %s1087_s22 = scalar_lea.vmem %s686_s10, 2048  ;;  %p1092_p3 = scmp.lt.s32.totalorder %s686_s10, %s686_s10 }
 0x1f4   :  { %p1088_p2 = scmp.ne.s32.totalorder %s686_s10, %s1087_s22  ;;  %p1093_p4 = scmp.lt.s32.totalorder %s1087_s22, %s1087_s22 }
 0x1f6   :  { %p1094_p5 = por %p1093_p4, %p1092_p3 }
 0x1f8   :  { %p1095_p6 = pnand %p1094_p5, %p1088_p2 }
 0x1fa   :  { %1098 = shalt.err (!%p1095_p6)
}
 0x1fb   :  { %s1099_s25 = scalar_lea.hbm %s1423_s7, 2048 }
 0x1fc   :  { %p1100_p7 = scmp.ne.s32.totalorder %s1423_s7, %s1099_s25  ;;  %p1103_p8 = scmp.lt.u32.totalorder %s1099_s25, %s1423_s7 }
 0x1fe   :  { %p1105_p9 = pnand %p1103_p8, %p1100_p7 }
 0x200   :  { %1108 = shalt.err (!%p1105_p9)
}
 0x201   :  { %691 = dma.vmem_to_hbm [thread:$0]  %s686_s10, 2048, %s1423_s7, [#allocation4], %s1138_s19, %s1138_s19, %s1139_s20  }
 0x202   :  { %s1142_s7 = smov [#allocation8]  }
 0x203   :  { %s709_s28 = sshll.u32 %s1142_s7, 4  ;;  %s710_s28 = int_to_ptr.vmem [resolvable:$true] %s709_s28 }
 0x204   :  { %s1109_s5 = scalar_lea.vmem %s710_s28, 2048  ;;  %p1114_p11 = scmp.lt.s32.totalorder %s710_s28, %s710_s28 }
 0x205   :  { %p1110_p10 = scmp.ne.s32.totalorder %s710_s28, %s1109_s5  ;;  %p1115_p12 = scmp.lt.s32.totalorder %s1109_s5, %s1109_s5 }
 0x207   :  { %p1116_p13 = por %p1115_p12, %p1114_p11 }
 0x209   :  { %p1117_p0 = pnand %p1116_p13, %p1110_p10 }
 0x2a0   :  { %v947_v38 = vpop.f32.mrb[16].mxu0 }
 0x2a1   :  { %626 = vst [vmem:[#allocation8 + $0x8] sm:$0xff] %v947_v38  ;;  %v546_v39 = vpop.f32.mrb[17].mxu0 }
 0x2a2   :  { %625 = vst [vmem:[#allocation8] sm:$0xff] %v546_v39 }
 0x2a4   :  { %v950_v40 = vpop.f32.mrb[18].mxu0 }
 0x2a5   :  { %628 = vst [vmem:[#allocation8 + $0x18] sm:$0xff] %v950_v40  ;;  %v556_v41 = vpop.f32.mrb[19].mxu0 }
 0x2a6   :  { %627 = vst [vmem:[#allocation8 + $0x10] sm:$0xff] %v556_v41 }
 0x2a8   :  { %v953_v42 = vpop.f32.mrb[20].mxu0 }
 0x2a9   :  { %630 = vst [vmem:[#allocation8 + $0x28] sm:$0xff] %v953_v42  ;;  %v566_v43 = vpop.f32.mrb[21].mxu0 }
 0x2aa   :  { %629 = vst [vmem:[#allocation8 + $0x20] sm:$0xff] %v566_v43 }
 0x2ac   :  { %v956_v44 = vpop.f32.mrb[22].mxu0 }
 0x2ad   :  { %632 = vst [vmem:[#allocation8 + $0x38] sm:$0xff] %v956_v44  ;;  %v576_v45 = vpop.f32.mrb[23].mxu0 }
 0x2ae   :  { %631 = vst [vmem:[#allocation8 + $0x30] sm:$0xff] %v576_v45 }
 0x2b0   :  { %v959_v46 = vpop.f32.mrb[24].mxu0 }
 0x2b1   :  { %634 = vst [vmem:[#allocation8 + $0x48] sm:$0xff] %v959_v46  ;;  %v586_v47 = vpop.f32.mrb[25].mxu0 }
 0x2b2   :  { %633 = vst [vmem:[#allocation8 + $0x40] sm:$0xff] %v586_v47 }
 0x2b4   :  { %v962_v48 = vpop.f32.mrb[26].mxu0 }
 0x2b5   :  { %636 = vst [vmem:[#allocation8 + $0x58] sm:$0xff] %v962_v48  ;;  %v596_v49 = vpop.f32.mrb[27].mxu0 }
 0x2b6   :  { %635 = vst [vmem:[#allocation8 + $0x50] sm:$0xff] %v596_v49 }
 0x2b8   :  { %v965_v50 = vpop.f32.mrb[28].mxu0 }
 0x2b9   :  { %638 = vst [vmem:[#allocation8 + $0x68] sm:$0xff] %v965_v50  ;;  %v606_v51 = vpop.f32.mrb[29].mxu0 }
 0x2ba   :  { %637 = vst [vmem:[#allocation8 + $0x60] sm:$0xff] %v606_v51 }
 0x2bc   :  { %v968_v52 = vpop.f32.mrb[30].mxu0 }
 0x2bd   :  { %640 = vst [vmem:[#allocation8 + $0x78] sm:$0xff] %v968_v52  ;;  %v616_v53 = vpop.f32.mrb[31].mxu0 }
 0x2be   :  { %639 = vst [vmem:[#allocation8 + $0x70] sm:$0xff] %v616_v53 }
 0x2bf   :  { %1120 = shalt.err (!%p1117_p0)
}
 0x2c0   :  { %s1121_s6 = scalar_lea.hbm %s1425_s9, 2048 }
 0x2c1   :  { %p1122_p1 = scmp.ne.s32.totalorder %s1425_s9, %s1121_s6  ;;  %p1125_p2 = scmp.lt.u32.totalorder %s1121_s6, %s1425_s9 }
 0x2c3   :  { %p1127_p3 = pnand %p1125_p2, %p1122_p1 }
 0x2c5   :  { %1130 = shalt.err (!%p1127_p3)
}
 0x2c6   :  { %715 = dma.vmem_to_hbm [thread:$0]  %s710_s28, 2048, %s1425_s9, [#allocation7], %s1138_s19, %s1138_s19, %s1139_s20  }
 0x2c7   :  { %1133 = dma.done.wait [#allocation4], 2048  }
 0x2c8   :  { %1134 = vsyncadd [#allocation4], 4294965248 }
 0x2c9   :  { %1135 = dma.done.wait [#allocation7], 4096  }
 0x2ca   :  { %1136 = vsyncadd [#allocation7], 4294963200 }
 0x2cb   :  { %725 = vsyncpa [#allocation3], 1 }
 0x2cc   :  { %726 = vsyncpa [#allocation4], 1 }
 0x2cd   :  { %727 = vsyncpa [#allocation7], 1 }

</bundles_post_ra>
